<compile_context>
chip_gen: v7x
topology: tpu7x:2x2x1
jax: 0.10.0
libtpu: 0.0.40
codegen_flags: <defaults>
</compile_context>

<pallas_src>
import numpy as np
import jax
import jax.numpy as jnp
from jax.experimental import pallas as pl
from jax.experimental.pallas import tpu as pltpu

NVAR = 7                              # number of ENSO state variables
NLIB = 1 + NVAR + 4 + 6 + 5 + 4 + 3   # = 30 original library terms
KPAD = 40                             # 5 aligned groups of 8 rows: xp, x0*xp, x1*xp, x2*xp, x3*xp


# ---------------------------------------------------------------------------
# Static mapping: kernel library row k -> column of the original (7, 30) pm.
# -1 marks duplicate / padding terms whose coefficient is forced to zero.
# ---------------------------------------------------------------------------
_NEW2ORIG = np.array([
    1, 2, 3, 4, 5, 6, 7, 0,            # group 0: x0..x6, 1
    8, 12, 13, 14, 15, 16, 17, -1,     # group 1: x0*[x0..x6, 1]  (last = x0, dup)
    -1, 9, 18, 19, 20, 21, 22, -1,     # group 2: x1*[x0..x6, 1]
    -1, -1, 10, 23, 24, 25, 26, -1,    # group 3: x2*[x0..x6, 1]
    -1, -1, -1, 11, 27, 28, 29, -1,    # group 4: x3*[x0..x6, 1]
], dtype=np.int32)
assert _NEW2ORIG.shape[0] == KPAD
assert sorted(c for c in _NEW2ORIG if c >= 0) == list(range(NLIB))
_GATHER = np.where(_NEW2ORIG >= 0, _NEW2ORIG, 0).astype(np.int32)
_MASK = (_NEW2ORIG >= 0).astype(np.float32)


# ---------------------------------------------------------------------------
# Pallas kernel: build the (40, TN) library slab with aligned full-group
# stores, then one fused MXU contraction  (7, 40) @ (40, TN) -> (7, TN).
# ---------------------------------------------------------------------------
def reg_kernel(xT_ref, pm_ref, o_ref, lib_ref):
    x = xT_ref[...]                                        # (7, TN), batch on lanes
    ones = jnp.ones((1, x.shape[1]), jnp.float32)
    xp = jnp.concatenate([x, ones], axis=0)                # (8, TN): [x0..x6, 1]

    # Five 8-row groups, each written with one aligned, unmasked full store.
    # The sublane broadcasts xp[k:k+1, :] go to the XLU (slack unit) and each
    # feeds exactly one multiply, so there is no repeated broadcast work.
    lib_ref[0:8, :] = xp                                   # 1, x0..x6
    lib_ref[8:16, :] = xp * xp[0:1, :]                     # x0 * [x0..x6, 1]
    lib_ref[16:24, :] = xp * xp[1:2, :]                    # x1 * [x0..x6, 1]
    lib_ref[24:32, :] = xp * xp[2:3, :]                    # x2 * [x0..x6, 1]
    lib_ref[32:40, :] = xp * xp[3:4, :]                    # x3 * [x0..x6, 1]

    # Single fused MXU contraction; duplicate/unused rows carry zero coeffs.
    o_ref[...] = jnp.dot(pm_ref[...], lib_ref[...],
                         preferred_element_type=jnp.float32)


# ---------------------------------------------------------------------------
# Wrappers
# ---------------------------------------------------------------------------
def _round_up(x, m):
    return m * ((x + m - 1) // m)


def _pick_block_n(n):
    """Largest power-of-two tile <= 16384 that keeps >= ~8 grid steps."""
    n128 = _round_up(max(int(n), 1), 128)
    cap = max(128, n128 // 8)          # keep the grid >= ~8 steps (>=2 for v7x)
    bn = 128
    while bn * 2 <= min(cap, 16384):
        bn *= 2
    return bn


def _permute_pm(param_matrix):
    """(7, 30) original param matrix -> (7, 40) kernel-layout param matrix."""
    pm = jnp.asarray(param_matrix, jnp.float32)
    return pm[:, _GATHER] * _MASK[None, :]


def reg_model_forward_t(t, x_t, param_matrix, *, block_n=None):
    """Native lane-dense entry point: x_t is (7, N) f32, returns (7, N).

    ODE / ensemble loops should keep state in this layout so no boundary
    transposes are needed at all.
    """
    del t  # unused, kept for signature parity with the PyTorch module
    x_t = jnp.asarray(x_t, jnp.float32)
    n = x_t.shape[1]
    if block_n is None:
        block_n = _pick_block_n(n)
    n_pad = _round_up(n, block_n)
    if n_pad != n:
        x_t = jnp.pad(x_t, ((0, 0), (0, n_pad - n)))       # zero-pad lanes

    pm_pad = _permute_pm(param_matrix)

    out_t = pl.pallas_call(
        reg_kernel,
        out_shape=jax.ShapeDtypeStruct((NVAR, n_pad), jnp.float32),
        grid=(n_pad // block_n,),
        in_specs=[
            pl.BlockSpec((NVAR, block_n), lambda i: (0, i)),   # x^T batch tile
            pl.BlockSpec((NVAR, KPAD), lambda i: (0, 0)),      # pm stays resident
        ],
        out_specs=pl.BlockSpec((NVAR, block_n), lambda i: (0, i)),
        scratch_shapes=[pltpu.VMEM((KPAD, block_n), jnp.float32)],
        compiler_params=pltpu.CompilerParams(
            dimension_semantics=("parallel",),   # safe: no cross-step scratch state
        ),
    )(x_t, pm_pad)

    return out_t if n_pad == n else out_t[:, :n]


def reg_model_forward(t, x, param_matrix, *, block_n=None):
    """Pallas equivalent of RegModel.forward(t, x); x is (N, 7), returns (N, 7)."""
    x_t = jnp.asarray(x, jnp.float32).T
    return reg_model_forward_t(t, x_t, param_matrix, block_n=block_n).T


# ---------------------------------------------------------------------------
# Parameter / CEI setup (deterministic, mirrors RegModel.__init__ + forward)
# ---------------------------------------------------------------------------
def build_cei():
    """Boolean coefficient-existence-indicator matrix, shape (7, 30)."""
    cei = np.zeros((7, NLIB - 1), dtype=bool)
    cei[0, 0:7] = True
    cei[1, 7:14] = True
    mask2 = np.zeros(NLIB - 1, dtype=bool)
    mask2[[0, 5, 10, 15, 20]] = True
    cei[2] = mask2
    cei[3, 2:6] = True          # row 3 never contributes parameters
    cei[4] = mask2              # keep sums of rows 4/5/6 == sum(row 2)
    cei[5] = mask2
    cei[6] = mask2
    # CEI = torch.cat([ones(7,1,bool), CEI], dim=-1)
    return np.concatenate([np.ones((7, 1), dtype=bool), cei], axis=-1)


def build_param_matrix(cei, key):
    ka, kb, kc, kd, ke, kf = jax.random.split(key, 6)
    a = jax.random.normal(ka, (int(cei[0].sum()),), jnp.float32)
    b = jax.random.normal(kb, (int(cei[1].sum()),), jnp.float32)
    c = jax.random.normal(kc, (int(cei[2].sum()),), jnp.float32)
    d = jax.random.normal(kd, (int(cei[4].sum()),), jnp.float32)
    e = jax.random.normal(ke, (int(cei[5].sum()),), jnp.float32)
    f = jax.random.normal(kf, (int(cei[6].sum()),), jnp.float32)

    pm = jnp.zeros((7, NLIB), jnp.float32)
    # Rows 4/5/6 are scattered with the CEI[2] mask, exactly as in the
    # PyTorch forward (param_matrix[4, self.CEI[2]] = self.d, etc.).
    m0, m1, m2 = (np.where(cei[i])[0] for i in (0, 1, 2))
    pm = pm.at[0, m0].set(a)
    pm = pm.at[1, m1].set(b)
    pm = pm.at[2, m2].set(c)
    pm = pm.at[4, m2].set(d)
    pm = pm.at[5, m2].set(e)
    pm = pm.at[6, m2].set(f)
    return pm


def reference_forward_np(x, pm):
    """float64 numpy reference of RegModel.forward for verification."""
    x = np.asarray(x, np.float64)
    lib = np.concatenate(
        [
            np.ones((x.shape[0], 1)),
            x,
            x[:, :4] ** 2,
            x[:, 0:1] * x[:, 1:],
            x[:, 1:2] * x[:, 2:],
            x[:, 2:3] * x[:, 3:],
            x[:, 3:4] * x[:, 4:],
        ],
        axis=-1,
    )
    return lib @ np.asarray(pm, np.float64).T


if __name__ == "__main__":
    key = jax.random.PRNGKey(0)
    k_x, k_p = jax.random.split(key)

    cei = build_cei()
    param_matrix = build_param_matrix(cei, k_p)

    batch = 1000            # small, deliberately not a multiple of 128 (exercises padding)
    x = jax.random.normal(k_x, (batch, NVAR), jnp.float32)
    t = jnp.float32(0.0)    # unused, kept for signature parity

    x_dot = reg_model_forward(t, x, param_matrix)
    x_dot = jax.block_until_ready(x_dot)

    ref = reference_forward_np(np.asarray(x), np.asarray(param_matrix))
    np.testing.assert_allclose(np.asarray(x_dot), ref, rtol=1e-4, atol=1e-4)
    print("KERNEL_OK")
</pallas_src>

<mosaic_0001>
module attributes {stable_mosaic.version = 11 : i64} {
  func.func @reg_kernel(%arg0: i32, %arg1: memref<7x128xf32, #tpu.memory_space<vmem>>, %arg2: memref<7x40xf32, #tpu.memory_space<vmem>>, %arg3: memref<7x128xf32, #tpu.memory_space<vmem>>, %arg4: memref<40x128xf32, #tpu.memory_space<vmem>>) attributes {dimension_semantics = [#tpu.dimension_semantics<parallel>], iteration_bounds = array<i64: 8>, scalar_prefetch = 0 : i64, scratch_operands = 1 : i64, tpu.core_type = #tpu.core_type<tc>, window_params = [{transform_indices = @transform_0, window_bounds = array<i64: 7, 128>}, {pipeline_mode = #tpu.pipeline_mode<synchronous>, transform_indices = @transform_1, window_bounds = array<i64: 7, 40>}, {transform_indices = @transform_2, window_bounds = array<i64: 7, 128>}]} {
    %c0 = arith.constant 0 : index
    %c0_0 = arith.constant 0 : index
    %0 = vector.load %arg1[%c0, %c0_0] : memref<7x128xf32, #tpu.memory_space<vmem>>, vector<7x128xf32>
    %cst = arith.constant 1.000000e+00 : f32
    %1 = vector.broadcast %cst : f32 to vector<1x128xf32>
    %2 = tpu.concatenate %0, %1 in 0 : vector<7x128xf32>, vector<1x128xf32> -> vector<8x128xf32>
    %c0_1 = arith.constant 0 : index
    %c0_2 = arith.constant 0 : index
    %3 = vector.load %arg4[%c0_1, %c0_2] : memref<40x128xf32, #tpu.memory_space<vmem>>, vector<8x128xf32>
    tpu.vector_store %arg4[%c0_1, %c0_2], %2 {strides = array<i32>} : memref<40x128xf32, #tpu.memory_space<vmem>>, vector<8x128xf32>,
    %4 = vector.extract_strided_slice %2 {offsets = [0, 0], sizes = [1, 128], strides = [1, 1]} : vector<8x128xf32> to vector<1x128xf32>
    %5 = vector.broadcast %4 : vector<1x128xf32> to vector<8x128xf32>
    %6 = arith.mulf %2, %5 : vector<8x128xf32>
    %c8 = arith.constant 8 : index
    %c0_3 = arith.constant 0 : index
    %7 = vector.load %arg4[%c8, %c0_3] : memref<40x128xf32, #tpu.memory_space<vmem>>, vector<8x128xf32>
    tpu.vector_store %arg4[%c8, %c0_3], %6 {strides = array<i32>} : memref<40x128xf32, #tpu.memory_space<vmem>>, vector<8x128xf32>,
    %8 = vector.extract_strided_slice %2 {offsets = [1, 0], sizes = [1, 128], strides = [1, 1]} : vector<8x128xf32> to vector<1x128xf32>
    %9 = vector.broadcast %8 : vector<1x128xf32> to vector<8x128xf32>
    %10 = arith.mulf %2, %9 : vector<8x128xf32>
    %c16 = arith.constant 16 : index
    %c0_4 = arith.constant 0 : index
    %11 = vector.load %arg4[%c16, %c0_4] : memref<40x128xf32, #tpu.memory_space<vmem>>, vector<8x128xf32>
    tpu.vector_store %arg4[%c16, %c0_4], %10 {strides = array<i32>} : memref<40x128xf32, #tpu.memory_space<vmem>>, vector<8x128xf32>,
    %12 = vector.extract_strided_slice %2 {offsets = [2, 0], sizes = [1, 128], strides = [1, 1]} : vector<8x128xf32> to vector<1x128xf32>
    %13 = vector.broadcast %12 : vector<1x128xf32> to vector<8x128xf32>
    %14 = arith.mulf %2, %13 : vector<8x128xf32>
    %c24 = arith.constant 24 : index
    %c0_5 = arith.constant 0 : index
    %15 = vector.load %arg4[%c24, %c0_5] : memref<40x128xf32, #tpu.memory_space<vmem>>, vector<8x128xf32>
    tpu.vector_store %arg4[%c24, %c0_5], %14 {strides = array<i32>} : memref<40x128xf32, #tpu.memory_space<vmem>>, vector<8x128xf32>,
    %16 = vector.extract_strided_slice %2 {offsets = [3, 0], sizes = [1, 128], strides = [1, 1]} : vector<8x128xf32> to vector<1x128xf32>
    %17 = vector.broadcast %16 : vector<1x128xf32> to vector<8x128xf32>
    %18 = arith.mulf %2, %17 : vector<8x128xf32>
    %c32 = arith.constant 32 : index
    %c0_6 = arith.constant 0 : index
    %19 = vector.load %arg4[%c32, %c0_6] : memref<40x128xf32, #tpu.memory_space<vmem>>, vector<8x128xf32>
    tpu.vector_store %arg4[%c32, %c0_6], %18 {strides = array<i32>} : memref<40x128xf32, #tpu.memory_space<vmem>>, vector<8x128xf32>,
    %c0_7 = arith.constant 0 : index
    %c0_8 = arith.constant 0 : index
    %20 = vector.load %arg2[%c0_7, %c0_8] : memref<7x40xf32, #tpu.memory_space<vmem>>, vector<7x40xf32>
    %c0_9 = arith.constant 0 : index
    %c0_10 = arith.constant 0 : index
    %21 = vector.load %arg4[%c0_9, %c0_10] : memref<40x128xf32, #tpu.memory_space<vmem>>, vector<40x128xf32>
    %cst_11 = arith.constant dense<0.000000e+00> : vector<7x128xf32>
    %22 = tpu.matmul %20, %21, %cst_11 {dimension_numbers = #tpu.dot_dimension_numbers<[1], [0], [0], [1], [0, 0, 1, 1], [], []>} : vector<7x40xf32>, vector<40x128xf32>, vector<7x128xf32> -> vector<7x128xf32>
    %c0_12 = arith.constant 0 : index
    %c0_13 = arith.constant 0 : index
    %23 = vector.load %arg3[%c0_12, %c0_13] : memref<7x128xf32, #tpu.memory_space<vmem>>, vector<7x128xf32>
    tpu.vector_store %arg3[%c0_12, %c0_13], %22 {strides = array<i32>} : memref<7x128xf32, #tpu.memory_space<vmem>>, vector<7x128xf32>,
    return
  }
  func.func @transform_0(%arg0: i32) -> (i32, i32) {
    %c0_i32 = arith.constant 0 : i32
    %c0_i32_0 = arith.constant 0 : i32
    return %c0_i32, %arg0 : i32, i32
  }
  func.func @transform_1(%arg0: i32) -> (i32, i32) {
    %c0_i32 = arith.constant 0 : i32
    %c0_i32_0 = arith.constant 0 : i32
    %c0_i32_1 = arith.constant 0 : i32
    return %c0_i32, %c0_i32_0 : i32, i32
  }
  func.func @transform_2(%arg0: i32) -> (i32, i32) {
    %c0_i32 = arith.constant 0 : i32
    %c0_i32_0 = arith.constant 0 : i32
    return %c0_i32, %arg0 : i32, i32
  }
}

</mosaic_0001>

<bundles_post_ra>
// kernel: tpu_custom_call.1
= control target key start
LH: loop header
LB: loop body
LE: loop exit
PB: predicated region body
PF: predicated region fallthrough
CT: control target
= control target key end

     0   :  { %7 = vsyncpa [#allocation4], 0  ;;  %s829_s0 = inlined_call_operand.hbm [shape: f32[7,1024], index: 0, kind: input, shape index: {}]   ;;  %s830_s1 = inlined_call_operand.hbm [shape: f32[7,40], index: 1, kind: input, shape index: {}]   ;;  %s831_s2 = inlined_call_operand.hbm [shape: f32[7,1024], index: 2, kind: output, shape index: {}]  }
   0x1   :  { %9 = vsyncpa [#allocation4 + $0x1], 0 }
   0x2   :  { %10 = vsyncpa [#allocation7], 0 }
   0x3   :  { %11 = vsyncpa [#allocation5], 0 }
   0x4   :  { %13 = vsyncpa [#allocation5 + $0x1], 0  ;;  %s626_s9 = smov 0   ;;  %s628_s10 = smov 0  }
   0x5   :  { %s630_s11 = smov 0   ;;  %s632_s12 = smov 0  }
   0x6 LB: > { %s647_s13 = sadd.s32 4294967295, %s603_s12   ;;  %s375_s14 = sadd.s32 4294967294, %s603_s12   ;;  %s603_s12 = sphi %s632_s12, %s854_s12   ;;  %s599_s11 = sphi %s630_s11, %s853_s11   ;;  %s595_s10 = sphi %s628_s10, %s852_s10   ;;  %s591_s9 = sphi %s626_s9, %s851_s9  }
   0x7   : > { %p39_p0 = scmp.ne.s32.totalorder %s595_s10, %s591_s9  ;;  %p832_p1 = scmp.eq.s32.totalorder %s647_s13, 0 }
   0x8   : > { %p90_p3 = scmp.eq.s32.totalorder %s375_s14, 7  ;;  %p376_p5 = scmp.ge.s32.totalorder %s603_s12, 1 }
   0x9   : > { %p656_p4 = por %p832_p1, %p39_p0  ;;  %p97_p7 = scmp.lt.s32.totalorder %s603_s12, 9 }
   0xa   : > { %p661_p6 = por %p90_p3, %p39_p0  ;;  %s605_s18 = smov [#allocation6]  }
   0xb   : > { %s835_s15 = scalar_select %p656_p4, 1, 0 }
   0xc   : > { %s836_s16 = scalar_select %p661_p6, 1, 0 }
   0xd   : > { %p666_p8 = pnand %p376_p5, %p97_p7  ;;  %s110_s19 = sshll.u32 %s605_s18, 4  ;;  %s111_s19 = int_to_ptr.vmem [resolvable:$true] %s110_s19 }
   0xe   : > { %s673_s20 = sadd.s32 1, %s603_s12   ;;  %s26_s24 = sadd.s32 1, %s599_s11 }
   0xf   : > { %s837_s17 = scalar_select %p666_p8, 1, 0 }
  0x10   : > { %p423_p9 = pneg %p666_p8  ;;  %s23_s22 = ssub.s32 %s603_s12, %s673_s20 }
  0x11   : > { %p683_p11 = scmp.eq.s32.totalorder %s23_s22, 0  ;;  %s475_s27 = scalar_lea.hbm %s830_s1, 128 }
  0x12   : > { %p677_p10 = pnand %p423_p9, %p832_p1  ;;  %p476_p13 = scmp.ne.s32.totalorder %s830_s1, %s475_s27 }
  0x13   : > { %s839_s23 = scalar_select %p683_p11, 1, 0 }
  0x14   : > { %p477_p0 = pneg %p677_p10  ;;  %p482_p7 = scmp.lt.u32.totalorder %s475_s27, %s830_s1 }
  0x16   : > { %p478_p3 = pnand %p477_p0, %p476_p13 }
  0x18   : > { %p479_p5 = pneg %p478_p3 }
  0x1a   : > { %p484_p9 = pnand %p482_p7, %p479_p5 }
  0x1c   : > { %487 = shalt.err (!%p484_p9)
}
  0x1d   : > { %s488_s4 = scalar_lea.vmem %s111_s19, 128  ;;  %p496_p6 = scmp.lt.s32.totalorder %s111_s19, %s111_s19 }
  0x1e   : > { %p489_p1 = scmp.ne.s32.totalorder %s111_s19, %s488_s4  ;;  %p497_p4 = scmp.lt.s32.totalorder %s488_s4, %s488_s4 }
  0x20   : > { %p491_p2 = pnand %p489_p1, %p477_p0  ;;  %p498_p8 = por %p497_p4, %p496_p6 }
  0x22   : > { %p492_p12 = pneg %p491_p2 }
  0x24   : > { %p499_p11 = pnand %p498_p8, %p492_p12 }
  0x26   : > { %502 = shalt.err (!%p499_p11)
}
  0x27   : > { %426 = dma.hbm_to_vmem [thread:$0]  (!%p677_p10), %s830_s1, 128, %s111_s19, [#allocation7]  }
  0x28   : > { %p840_p1 = scmp.ne.s32.totalorder %s839_s23, 0  ;;  %p34_p2 = scmp.eq.s32.totalorder %s603_s12, 0 }
  0x29   : > { %p841_p4 = scmp.ne.s32.totalorder %s599_s11, %s595_s10  ;;  %p842_p6 = scmp.eq.s32.totalorder %s647_s13, 7 }
  0x2a   : > { %s709_s7 = scalar_select %p840_p1, %s599_s11, %s26_s24  }
  0x2b   : > { %p717_p8 = por %p842_p6, %p841_p4  ;;  %p436_p11 = scmp.lt.s32.totalorder %s603_s12, 8 }
  0x2c   : > { %s121_s14 = sand.u32 1, %s599_s11   ;;  %p844_p12 = pmov %p841_p4 }
  0x2d   : > { %s379_s18 = sshll.u32 %s121_s14, 3  ;;  %s380_s21 = sshll.u32 %s603_s12, 7 }
  0x2e   : > { %p35_p13 = por %p34_p2, %p844_p12  ;;  %s730_s19 = scalar_lea.hbm %s829_s0, %s380_s21 }
  0x2f   : > { %s125_s23 = scalar_lea.vmem [#allocation3], %s379_s18  ;;  %s122_s27 = scalar_lea.sflag [#allocation4], %s121_s14 }
  0x30   : > { %s132_s24 = sshll.u32 %s125_s23, 4  ;;  %p732_p10 = pnand %p436_p11, %p35_p13  ;;  %s736_s24 = int_to_ptr.vmem [resolvable:$true] %s132_s24 }
  0x31   : > { %s503_s28 = scalar_lea.hbm %s730_s19, 128  ;;  %s508_s3 = scalar_lea.hbm %s829_s0, 1024 }
  0x32   : > { %p504_p0 = scmp.ne.s32.totalorder %s730_s19, %s503_s28  ;;  %p505_p3 = pneg %p732_p10 }
  0x33   : > { %p509_p9 = scmp.lt.u32.totalorder %s730_s19, %s829_s0  ;;  %p510_p1 = scmp.lt.u32.totalorder %s508_s3, %s503_s28 }
  0x34   : > { %p506_p5 = pnand %p505_p3, %p504_p0  ;;  %p512_p4 = scmp.lt.u32.totalorder %s503_s28, %s730_s19 }
  0x35   : > { %p511_p2 = por %p510_p1, %p509_p9 }
  0x36   : > { %p507_p7 = pneg %p506_p5 }
  0x37   : > { %p513_p6 = por %p512_p4, %p511_p2 }
  0x39   : > { %p514_p11 = pnand %p513_p6, %p507_p7 }
  0x3b   : > { %517 = shalt.err (!%p514_p11)
}
  0x3c   : > { %s518_s6 = scalar_lea.vmem %s736_s24, 128  ;;  %s606_s14 = smov [#allocation3]  }
  0x3d   : > { %p519_p12 = scmp.ne.s32.totalorder %s736_s24, %s518_s6  ;;  %s523_s18 = sshll.u32 %s606_s14, 4  ;;  %s524_s18 = int_to_ptr.vmem [resolvable:$false] %s523_s18 }
  0x3e   : > { %s525_s21 = scalar_lea.vmem %s524_s18, 256  ;;  %p526_p5 = scmp.lt.s32.totalorder %s736_s24, %s524_s18 }
  0x3f   : > { %p521_p13 = pnand %p519_p12, %p505_p3  ;;  %p527_p9 = scmp.lt.s32.totalorder %s525_s21, %s518_s6 }
  0x41   : > { %p522_p0 = pneg %p521_p13  ;;  %p528_p1 = por %p527_p9, %p526_p5 }
  0x43   : > { %p529_p2 = pnand %p528_p1, %p522_p0 }
  0x45   : > { %532 = shalt.err (!%p529_p2)
}
  0x46   : > { %430 = dma.hbm_to_vmem [thread:$0]  (!%p732_p10), %s730_s19, 128, %s736_s24, %s122_s27  }
  0x47   : > { %p846_p7 = scmp.ne.s32.totalorder %s837_s17, 0 }
  0x48   : > { %s766_s22 = sand.u32 (!%p846_p7), 1, %s595_s10   ;;  %p847_p3 = scmp.ne.s32.totalorder (!%p846_p7), %s835_s15, 0 }
  0x49   : > { %141 = sbr.rel (%p846_p7) target bundleno = 331 (0x14b), region = 28  ;;  %s382_s25 = sshll.u32 (!%p846_p7), %s766_s22, 3 }
  0x4a   : > { %s144_s23 = scalar_lea.sflag (!%p846_p7), [#allocation4], %s766_s22  ;;  %s147_s28 = scalar_lea.vmem (!%p846_p7), [#allocation3], %s382_s25 }
  0x50   : > { %578 = dma.done.wait (%p847_p3), %s144_s23, 128  }
  0x51   : > { %580 = vsyncadd (%p847_p3), %s144_s23, 4294967168  ;;  %p848_p10 = scmp.eq.s32.totalorder %s647_s13, 0 }
  0x53   : > { %582 = dma.done.wait (%p848_p10), [#allocation7], 128   ;;  %p849_p4 = pmov %p848_p10 }
  0x54   : > { %v176_v0 = vlaneseq  ;;  %v607_v1 = vmov 0.0|0.0   ;;  %vm608_vm0 = vmmov 0   ;;  %v609_v3 = vmov 0.0   ;;  %v172_v7 = vld [vmem:[%s147_s28] sm:$0x7f]  ;;  %s171_s15 = scalar_lea.vmem [#allocation8], %s382_s25 }
  0x55   : > { %584 = vsyncadd (%p849_p4), [#allocation7], 4294967168  ;;  %409 = vmatprep.subr.bf16.mxu0 %v607_v1  ;;  %406 = vmatprep.mubr.msk.f32.mxu0 %vm608_vm0, %v609_v3  ;;  %vm173_vm1 = vcmask 1046528   ;;  %v200_v20 = vld [vmem:[#allocation6] sm:$0x7f]  ;;  %vm206_vm2 = vcmask 326656  }
  0x56   : > { %v177_v2 = vshrl.u32 %v176_v0, 7  ;;  %v174_v8 = vsel %vm173_vm1, %v172_v7, 1.0  ;;  %s295_s17 = sshll.u32 %s171_s15, 4  ;;  %s387_s19 = sshll.u32 %s647_s13, 7  ;;  %s783_s17 = int_to_ptr.vmem [resolvable:$true] %s295_s17 }
  0x57   : > { %s788_s27 = scalar_lea.hbm %s831_s2, %s387_s19  ;;  %s282_s29 = scalar_lea.sflag [#allocation5], %s766_s22 }
  0x58   : > { %v178_v4 = vsub.s32 0, %v177_v2  ;;  %v184_v5 = vsub.s32 1, %v177_v2  ;;  %v190_v6 = vsub.s32 2, %v177_v2  ;;  %v196_v15 = vsub.s32 3, %v177_v2  ;;  %s533_s30 = scalar_lea.vmem %s783_s17, 128  ;;  %s610_s13 = smov [#allocation8]  }
  0x59   : > { %p534_p6 = scmp.ne.s32.totalorder %s783_s17, %s533_s30  ;;  %s537_s3 = sshll.u32 %s610_s13, 4  ;;  %s538_s3 = int_to_ptr.vmem [resolvable:$false] %s537_s3 }
  0x5a   : > { %v179_v9 = vrot.slane %v174_v8, %v178_v4  ;;  %v185_v10 = vrot.slane %v174_v8, %v184_v5  ;;  %v191_v11 = vrot.slane %v174_v8, %v190_v6  ;;  %v197_v18 = vrot.slane %v174_v8, %v196_v15  ;;  %s539_s4 = scalar_lea.vmem %s538_s3, 256  ;;  %p540_p13 = scmp.lt.s32.totalorder %s783_s17, %s538_s3 }
  0x5b   : > { %p535_p11 = pnand %p534_p6, %p717_p8  ;;  %p541_p0 = scmp.lt.s32.totalorder %s539_s4, %s533_s30 }
  0x5c   : > { %v180_v12 = vmul.f32 %v179_v9, %v174_v8  ;;  %v186_v13 = vmul.f32 %v185_v10, %v174_v8  ;;  %v192_v14 = vmul.f32 %v191_v11, %v174_v8  ;;  %v198_v19 = vmul.f32 %v197_v18, %v174_v8 }
  0x5d   : > { %p536_p12 = pneg %p535_p11  ;;  %p542_p5 = por %p541_p0, %p540_p13 }
  0x5e   : > { %v410_v16 = vpack.c.bf16 %v180_v12, %v174_v8  ;;  %v413_v17 = vpack.c.bf16 %v192_v14, %v186_v13 }
  0x5f   : > { %p543_p9 = pnand %p542_p5, %p536_p12 }
  0x60   : > { %411 = vmatpush3.bf16.msra.mxu0 %v410_v16 }
  0x61   : > { %412 = vmatprep.subr.bf16.mxu0 %v607_v1 }
  0x64   : > { %414 = vmatpush3.bf16.msra.mxu0 %v413_v17 }
  0x65   : > { %404 = vmatprep.subr.mxu0 %v609_v3 }
  0x68   : > { %405 = vmatpush3.msra.mxu0 %v198_v19 }
  0x69   : > { %407 = vmatmul.mubr.msk.f32.vlgmr.msra.gmra.mrb[0].mxu0 %vm206_vm2, %v200_v20 }
 0x13c   : > { %v276_v21 = vpop.f32.mrb[0].mxu0 }
 0x13d   : > { %280 = vst [vmem:[%s171_s15] sm:$0x7f] %v276_v21  ;;  %v408_v22 = vpop.f32.mrb[1].mxu0 }
 0x13e   : > { %546 = shalt.err (!%p543_p9)
}
 0x13f   : > { %s547_s5 = scalar_lea.hbm %s788_s27, 128  ;;  %s551_s18 = scalar_lea.hbm %s831_s2, 1024 }
 0x140   : > { %p548_p1 = scmp.ne.s32.totalorder %s788_s27, %s547_s5  ;;  %p552_p3 = scmp.lt.u32.totalorder %s788_s27, %s831_s2 }
 0x141   : > { %p553_p10 = scmp.lt.u32.totalorder %s551_s18, %s547_s5  ;;  %p555_p6 = scmp.lt.u32.totalorder %s547_s5, %s788_s27 }
 0x142   : > { %p549_p2 = pnand %p548_p1, %p717_p8 }
 0x143   : > { %p554_p4 = por %p553_p10, %p552_p3 }
 0x144   : > { %p550_p7 = pneg %p549_p2 }
 0x145   : > { %p556_p11 = por %p555_p6, %p554_p4 }
 0x147   : > { %p557_p12 = pnand %p556_p11, %p550_p7 }
 0x149   : > { %560 = shalt.err (!%p557_p12)
}
 0x14a   : > { %421 = dma.vmem_to_hbm [thread:$0]  (%p717_p8), %s783_s17, 128, %s788_s27, %s282_s29  }
 0x14b PF: > { %p438_p13 = scmp.ge.s32.totalorder %s603_s12, 2  ;;  %s307_s25 = sand.u32 1, %s591_s9  }
 0x14c   : > { %p850_p0 = scmp.ne.s32.totalorder %s836_s16, 0  ;;  %s308_s23 = scalar_lea.sflag [#allocation5], %s307_s25 }
 0x14e   : > { %p432_p5 = pnand %p438_p13, %p850_p0 }
 0x150   : > { %586 = dma.done.wait (!%p432_p5), %s308_s23, 128  }
 0x151   : > { %588 = vsyncadd (!%p432_p5), %s308_s23, 4294967168  ;;  %p16_p9 = scmp.ge.s32.totalorder %s673_s20, 10   ;;  %s851_s9 = smov %s595_s10 }
 0x152   : > { %s852_s10 = smov %s599_s11  ;;  %s853_s11 = smov %s709_s7 }
 0x153   : > { %s854_s12 = smov %s673_s20  ;;  %18 = sbr.rel (!%p16_p9) target bundleno = 6 (0x6), region = 77 }
 0x15a   :  { %313 = vsyncpa [#allocation4], 1 }
 0x15b   :  { %315 = vsyncpa [#allocation4 + $0x1], 1 }
 0x15c   :  { %316 = vsyncpa [#allocation7], 1 }
 0x15d   :  { %317 = vsyncpa [#allocation5], 1 }
 0x15e   :  { %319 = vsyncpa [#allocation5 + $0x1], 1 }

</bundles_post_ra>
